<compile_context>
chip_gen: v5e
topology: v5e:2x2
jax: 0.10.0
libtpu: 0.0.40
codegen_flags: <defaults>
</compile_context>

<pallas_src>
import functools

import jax
import jax.numpy as jnp
from jax.experimental import pallas as pl
from jax.experimental.pallas import tpu as pltpu

_LANE = 128
_SUBLANE = 8


def _round_up(x, m):
    return -(-x // m) * m


def _wd_loss_kernel(lam_ref, real_ref, fake_ref, gz_ref, out_ref,
                    row_acc_ref, gp_acc_ref, *, tile_d, inv_b, pad_rows):
    i = pl.program_id(0)          # batch-tile index
    j = pl.program_id(1)          # D-tile index (reduction axis, innermost)
    nb = pl.num_programs(0)
    nd = pl.num_programs(1)

    @pl.when((i == 0) & (j == 0))
    def _init_gp():
        gp_acc_ref[0] = jnp.float32(0.0)

    @pl.when(j == 0)
    def _init_rows():
        row_acc_ref[...] = jnp.zeros_like(row_acc_ref)

    # Accumulate per-row sum-of-squares as (TILE_B, 128) lane partials using
    # VALU adds over 128-lane chunks (bounded live vregs, no full-tile temp).
    for c in range(tile_d // _LANE):
        chunk = gz_ref[:, c * _LANE:(c + 1) * _LANE]
        row_acc_ref[...] += chunk * chunk

    @pl.when(j == nd - 1)
    def _finish_rows():
        sq = jnp.sum(row_acc_ref[...], axis=1, keepdims=True)     # (TILE_B, 1)
        norms = jnp.sqrt(sq)
        gp_acc_ref[0] += jnp.sum((norms - 1.0) ** 2)

        @pl.when(i == nb - 1)
        def _finalize():
            lam = lam_ref[0]
            real_sum = jnp.sum(real_ref[...])
            fake_sum = jnp.sum(fake_ref[...])
            # Each zero-padded row contributes exactly (sqrt(0)-1)^2 == 1.0.
            gp_sum = gp_acc_ref[0] - pad_rows
            out_ref[0, 0] = (real_sum - fake_sum - lam * gp_sum) * inv_b


def wd_loss(real, fake, gradient_z, lambda_gp, *, tile_b=None, tile_d=None):
    """Pallas WGAN-GP loss.

    real/fake: (B, 1) (or (B,)) f32 critic scores; gradient_z: (B, D) f32
    (norm taken over dim=1, matching torch's `.norm(p=2, dim=1)` on 2-D input);
    lambda_gp: python / jnp scalar. Returns an f32 scalar.
    """
    real = jnp.asarray(real, jnp.float32).reshape(1, -1)   # lane-dense (1, B)
    fake = jnp.asarray(fake, jnp.float32).reshape(1, -1)
    gz = jnp.asarray(gradient_z, jnp.float32)
    if gz.ndim != 2:
        raise ValueError("gradient_z must be 2-D (B, D); flatten it first.")
    lam = jnp.asarray(lambda_gp, jnp.float32).reshape((1,))

    b, d = gz.shape

    # ---- tile sizing (HBM-bandwidth-bound streaming reduction) --------------
    d_lanes = _round_up(d, _LANE)
    if tile_d is None:
        tile_d = min(d_lanes, 2048)
    else:
        tile_d = max(_LANE, _round_up(tile_d, _LANE))
    if tile_b is None:
        budget_elems = (4 * 1024 * 1024) // 4     # ~4 MiB f32 per gz buffer
        tile_b = max(_SUBLANE, (budget_elems // tile_d) // _SUBLANE * _SUBLANE)
    else:
        tile_b = max(_SUBLANE, _round_up(tile_b, _SUBLANE))
    tile_b = min(tile_b, _round_up(b, _SUBLANE))

    b_pad = _round_up(b, tile_b)
    d_pad = _round_up(d, tile_d)
    if b_pad != b or d_pad != d:
        gz = jnp.pad(gz, ((0, b_pad - b), (0, d_pad - d)))

    grid = (b_pad // tile_b, d_pad // tile_d)

    kernel = functools.partial(
        _wd_loss_kernel,
        tile_d=tile_d,
        inv_b=1.0 / float(b),
        pad_rows=float(b_pad - b),
    )

    gz_tile_bytes = tile_b * tile_d * 4
    vmem_limit = min(
        32 * 1024 * 1024,
        2 * gz_tile_bytes                       # double-buffered gradient tile
        + tile_b * _LANE * 4                    # row_acc scratch
        + 4 * (real.size + fake.size) * 4       # (generous) real/fake residency
        + (4 << 20),                            # slack for compiler internals
    )

    out = pl.pallas_call(
        kernel,
        out_shape=jax.ShapeDtypeStruct((1, 1), jnp.float32),
        grid_spec=pltpu.PrefetchScalarGridSpec(
            num_scalar_prefetch=1,              # lambda_gp -> SMEM
            grid=grid,
            in_specs=[
                pl.BlockSpec((1, real.shape[1]), lambda i, j, lam_r: (0, 0)),
                pl.BlockSpec((1, fake.shape[1]), lambda i, j, lam_r: (0, 0)),
                pl.BlockSpec((tile_b, tile_d), lambda i, j, lam_r: (i, j)),
            ],
            out_specs=pl.BlockSpec(memory_space=pltpu.SMEM),
            scratch_shapes=[
                pltpu.VMEM((tile_b, _LANE), jnp.float32),   # per-row sq-sum partials
                pltpu.SMEM((1,), jnp.float32),              # gradient-penalty sum
            ],
        ),
        compiler_params=pltpu.CompilerParams(
            dimension_semantics=("arbitrary", "arbitrary"),
            vmem_limit_bytes=int(vmem_limit),
        ),
    )(lam, real, fake, gz)
    return out[0, 0]


if __name__ == "__main__":
    key = jax.random.PRNGKey(0)
    k1, k2, k3 = jax.random.split(key, 3)

    B, D = 20, 384
    real = jax.random.normal(k1, (B, 1), dtype=jnp.float32)
    fake = jax.random.normal(k2, (B, 1), dtype=jnp.float32)
    gradient_z = jax.random.normal(k3, (B, D), dtype=jnp.float32)
    lambda_gp = 10.0

    # Pure-JAX reference (same semantics as the PyTorch forward).
    ref = (
        jnp.mean(real)
        - jnp.mean(fake)
        - lambda_gp * jnp.mean((jnp.linalg.norm(gradient_z, axis=1) - 1.0) ** 2)
    )

    loss = jax.block_until_ready(wd_loss(real, fake, gradient_z, lambda_gp))
    assert jnp.allclose(loss, ref, rtol=1e-4, atol=1e-4), (loss, ref)

    # Exercise the multi-tile grid path (3x3 grid, padded batch rows) too.
    loss_tiled = jax.block_until_ready(
        wd_loss(real, fake, gradient_z, lambda_gp, tile_b=8, tile_d=128)
    )
    assert jnp.allclose(loss_tiled, ref, rtol=1e-4, atol=1e-4), (loss_tiled, ref)

    print("KERNEL_OK")
</pallas_src>

<mosaic_0001>
module attributes {stable_mosaic.version = 11 : i64} {
  func.func @_wd_loss_kernel(%arg0: i32, %arg1: i32, %arg2: memref<1xf32, #tpu.memory_space<smem>>, %arg3: memref<1x20xf32, #tpu.memory_space<vmem>>, %arg4: memref<1x20xf32, #tpu.memory_space<vmem>>, %arg5: memref<24x384xf32, #tpu.memory_space<vmem>>, %arg6: memref<1x1xf32, #tpu.memory_space<smem>>, %arg7: memref<24x128xf32, #tpu.memory_space<vmem>>, %arg8: memref<1xf32, #tpu.memory_space<smem>>) attributes {dimension_semantics = [#tpu.dimension_semantics<arbitrary>, #tpu.dimension_semantics<arbitrary>], iteration_bounds = array<i64: 1, 1>, scalar_prefetch = 1 : i64, scratch_operands = 2 : i64, tpu.core_type = #tpu.core_type<tc>, window_params = [{pipeline_mode = #tpu.pipeline_mode<synchronous>, transform_indices = @transform_0, window_bounds = array<i64: 1, 20>}, {pipeline_mode = #tpu.pipeline_mode<synchronous>, transform_indices = @transform_1, window_bounds = array<i64: 1, 20>}, {transform_indices = @transform_2, window_bounds = array<i64: 24, 384>}, {transform_indices = @transform_3, window_bounds = array<i64: 1, 1>}]} {
    %c0_i32 = arith.constant 0 : i32
    %0 = arith.cmpi eq, %arg0, %c0_i32 : i32
    %c0_i32_0 = arith.constant 0 : i32
    %1 = arith.cmpi eq, %arg1, %c0_i32_0 : i32
    %2 = arith.andi %0, %1 : i1
    %3 = arith.extui %2 : i1 to i32
    %c0_i32_1 = arith.constant 0 : i32
    %4 = arith.cmpi ne, %3, %c0_i32_1 : i32
    scf.if %4 {
      %cst = arith.constant 0.000000e+00 : f32
      %c0_21 = arith.constant 0 : index
      %26 = memref.load %arg8[%c0_21] : memref<1xf32, #tpu.memory_space<smem>>
      memref.store %cst, %arg8[%c0_21] : memref<1xf32, #tpu.memory_space<smem>>
    } else {
    }
    %c0_i32_2 = arith.constant 0 : i32
    %5 = arith.cmpi eq, %arg1, %c0_i32_2 : i32
    %6 = arith.extui %5 : i1 to i32
    %c0_i32_3 = arith.constant 0 : i32
    %7 = arith.cmpi ne, %6, %c0_i32_3 : i32
    scf.if %7 {
      %cst = arith.constant 0.000000e+00 : f32
      %26 = vector.broadcast %cst : f32 to vector<24x128xf32>
      %c0_21 = arith.constant 0 : index
      %c0_22 = arith.constant 0 : index
      %27 = vector.load %arg7[%c0_21, %c0_22] : memref<24x128xf32, #tpu.memory_space<vmem>>, vector<24x128xf32>
      tpu.vector_store %arg7[%c0_21, %c0_22], %26 {strides = array<i32>} : memref<24x128xf32, #tpu.memory_space<vmem>>, vector<24x128xf32>,
    } else {
    }
    %c0 = arith.constant 0 : index
    %c0_4 = arith.constant 0 : index
    %8 = vector.load %arg5[%c0, %c0_4] : memref<24x384xf32, #tpu.memory_space<vmem>>, vector<24x128xf32>
    %c0_5 = arith.constant 0 : index
    %c0_6 = arith.constant 0 : index
    %9 = vector.load %arg7[%c0_5, %c0_6] : memref<24x128xf32, #tpu.memory_space<vmem>>, vector<24x128xf32>
    %10 = arith.mulf %8, %8 : vector<24x128xf32>
    %11 = arith.addf %9, %10 : vector<24x128xf32>
    %c0_7 = arith.constant 0 : index
    %c0_8 = arith.constant 0 : index
    %12 = vector.load %arg7[%c0_7, %c0_8] : memref<24x128xf32, #tpu.memory_space<vmem>>, vector<24x128xf32>
    tpu.vector_store %arg7[%c0_7, %c0_8], %11 {strides = array<i32>} : memref<24x128xf32, #tpu.memory_space<vmem>>, vector<24x128xf32>,
    %c0_9 = arith.constant 0 : index
    %c128 = arith.constant 128 : index
    %13 = vector.load %arg5[%c0_9, %c128] : memref<24x384xf32, #tpu.memory_space<vmem>>, vector<24x128xf32>
    %c0_10 = arith.constant 0 : index
    %c0_11 = arith.constant 0 : index
    %14 = vector.load %arg7[%c0_10, %c0_11] : memref<24x128xf32, #tpu.memory_space<vmem>>, vector<24x128xf32>
    %15 = arith.mulf %13, %13 : vector<24x128xf32>
    %16 = arith.addf %14, %15 : vector<24x128xf32>
    %c0_12 = arith.constant 0 : index
    %c0_13 = arith.constant 0 : index
    %17 = vector.load %arg7[%c0_12, %c0_13] : memref<24x128xf32, #tpu.memory_space<vmem>>, vector<24x128xf32>
    tpu.vector_store %arg7[%c0_12, %c0_13], %16 {strides = array<i32>} : memref<24x128xf32, #tpu.memory_space<vmem>>, vector<24x128xf32>,
    %c0_14 = arith.constant 0 : index
    %c256 = arith.constant 256 : index
    %18 = vector.load %arg5[%c0_14, %c256] : memref<24x384xf32, #tpu.memory_space<vmem>>, vector<24x128xf32>
    %c0_15 = arith.constant 0 : index
    %c0_16 = arith.constant 0 : index
    %19 = vector.load %arg7[%c0_15, %c0_16] : memref<24x128xf32, #tpu.memory_space<vmem>>, vector<24x128xf32>
    %20 = arith.mulf %18, %18 : vector<24x128xf32>
    %21 = arith.addf %19, %20 : vector<24x128xf32>
    %c0_17 = arith.constant 0 : index
    %c0_18 = arith.constant 0 : index
    %22 = vector.load %arg7[%c0_17, %c0_18] : memref<24x128xf32, #tpu.memory_space<vmem>>, vector<24x128xf32>
    tpu.vector_store %arg7[%c0_17, %c0_18], %21 {strides = array<i32>} : memref<24x128xf32, #tpu.memory_space<vmem>>, vector<24x128xf32>,
    %c0_i32_19 = arith.constant 0 : i32
    %23 = arith.cmpi eq, %arg1, %c0_i32_19 : i32
    %24 = arith.extui %23 : i1 to i32
    %c0_i32_20 = arith.constant 0 : i32
    %25 = arith.cmpi ne, %24, %c0_i32_20 : i32
    scf.if %25 {
      %c0_21 = arith.constant 0 : index
      %c0_22 = arith.constant 0 : index
      %26 = vector.load %arg7[%c0_21, %c0_22] : memref<24x128xf32, #tpu.memory_space<vmem>>, vector<24x128xf32>
      %cst = arith.constant dense<0.000000e+00> : vector<24xf32>
      %27 = vector.multi_reduction <add>, %26, %cst [1] : vector<24x128xf32> to vector<24xf32>
      %28 = vector.shape_cast %27 : vector<24xf32> to vector<24x1xf32>
      %29 = math.sqrt %28 : vector<24x1xf32>
      %c0_23 = arith.constant 0 : index
      %30 = memref.load %arg8[%c0_23] : memref<1xf32, #tpu.memory_space<smem>>
      %cst_24 = arith.constant 1.000000e+00 : f32
      %31 = vector.broadcast %cst_24 : f32 to vector<24x1xf32>
      %32 = arith.subf %29, %31 : vector<24x1xf32>
      %33 = arith.mulf %32, %32 : vector<24x1xf32>
      %34 = vector.shape_cast %33 : vector<24x1xf32> to vector<1x24x1xf32>
      %cst_25 = arith.constant dense<0.000000e+00> : vector<1xf32>
      %35 = vector.multi_reduction <add>, %34, %cst_25 [1, 2] : vector<1x24x1xf32> to vector<1xf32>
      %36 = vector.shape_cast %35 : vector<1xf32> to vector<1x1x1xf32>
      %37 = vector.extract %36[0, 0, 0] : f32 from vector<1x1x1xf32>
      %38 = arith.addf %30, %37 : f32
      %c0_26 = arith.constant 0 : index
      %39 = memref.load %arg8[%c0_26] : memref<1xf32, #tpu.memory_space<smem>>
      memref.store %38, %arg8[%c0_26] : memref<1xf32, #tpu.memory_space<smem>>
      %c0_i32_27 = arith.constant 0 : i32
      %40 = arith.cmpi eq, %arg0, %c0_i32_27 : i32
      %41 = arith.extui %40 : i1 to i32
      %c0_i32_28 = arith.constant 0 : i32
      %42 = arith.cmpi ne, %41, %c0_i32_28 : i32
      scf.if %42 {
        %c0_29 = arith.constant 0 : index
        %43 = memref.load %arg2[%c0_29] : memref<1xf32, #tpu.memory_space<smem>>
        %c0_30 = arith.constant 0 : index
        %c0_31 = arith.constant 0 : index
        %44 = vector.load %arg3[%c0_30, %c0_31] : memref<1x20xf32, #tpu.memory_space<vmem>>, vector<1x20xf32>
        %45 = vector.shape_cast %44 : vector<1x20xf32> to vector<1x1x20xf32>
        %cst_32 = arith.constant dense<0.000000e+00> : vector<1xf32>
        %46 = vector.multi_reduction <add>, %45, %cst_32 [1, 2] : vector<1x1x20xf32> to vector<1xf32>
        %47 = vector.shape_cast %46 : vector<1xf32> to vector<1x1x1xf32>
        %48 = vector.extract %47[0, 0, 0] : f32 from vector<1x1x1xf32>
        %c0_33 = arith.constant 0 : index
        %c0_34 = arith.constant 0 : index
        %49 = vector.load %arg4[%c0_33, %c0_34] : memref<1x20xf32, #tpu.memory_space<vmem>>, vector<1x20xf32>
        %50 = vector.shape_cast %49 : vector<1x20xf32> to vector<1x1x20xf32>
        %cst_35 = arith.constant dense<0.000000e+00> : vector<1xf32>
        %51 = vector.multi_reduction <add>, %50, %cst_35 [1, 2] : vector<1x1x20xf32> to vector<1xf32>
        %52 = vector.shape_cast %51 : vector<1xf32> to vector<1x1x1xf32>
        %53 = vector.extract %52[0, 0, 0] : f32 from vector<1x1x1xf32>
        %c0_36 = arith.constant 0 : index
        %54 = memref.load %arg8[%c0_36] : memref<1xf32, #tpu.memory_space<smem>>
        %cst_37 = arith.constant 4.000000e+00 : f32
        %55 = arith.subf %54, %cst_37 : f32
        %56 = arith.subf %48, %53 : f32
        %57 = arith.mulf %43, %55 : f32
        %58 = arith.subf %56, %57 : f32
        %cst_38 = arith.constant 5.000000e-02 : f32
        %59 = arith.mulf %58, %cst_38 : f32
        %c0_39 = arith.constant 0 : index
        %c0_40 = arith.constant 0 : index
        %60 = memref.load %arg6[%c0_39, %c0_40] : memref<1x1xf32, #tpu.memory_space<smem>>
        memref.store %59, %arg6[%c0_39, %c0_40] : memref<1x1xf32, #tpu.memory_space<smem>>
      } else {
      }
    } else {
    }
    return
  }
  func.func @transform_0(%arg0: i32, %arg1: i32, %arg2: memref<1xf32, #tpu.memory_space<smem>>) -> (i32, i32) {
    %c0_i32 = arith.constant 0 : i32
    %c0_i32_0 = arith.constant 0 : i32
    %c0_i32_1 = arith.constant 0 : i32
    return %c0_i32, %c0_i32_0 : i32, i32
  }
  func.func @transform_1(%arg0: i32, %arg1: i32, %arg2: memref<1xf32, #tpu.memory_space<smem>>) -> (i32, i32) {
    %c0_i32 = arith.constant 0 : i32
    %c0_i32_0 = arith.constant 0 : i32
    %c0_i32_1 = arith.constant 0 : i32
    return %c0_i32, %c0_i32_0 : i32, i32
  }
  func.func @transform_2(%arg0: i32, %arg1: i32, %arg2: memref<1xf32, #tpu.memory_space<smem>>) -> (i32, i32) {
    %c0_i32 = arith.constant 0 : i32
    return %arg0, %arg1 : i32, i32
  }
  func.func @transform_3(%arg0: i32, %arg1: i32, %arg2: memref<1xf32, #tpu.memory_space<smem>>) -> (i32, i32) {
    %c0_i32 = arith.constant 0 : i32
    %c0_i32_0 = arith.constant 0 : i32
    %c0_i32_1 = arith.constant 0 : i32
    return %c0_i32, %c0_i32_0 : i32, i32
  }
}

</mosaic_0001>

<bundles_post_ra>
// kernel: tpu_custom_call.1
= control target key start
LH: loop header
LB: loop body
LE: loop exit
PB: predicated region body
PF: predicated region fallthrough
CT: control target
= control target key end

     0   :  { %10 = vsyncpa [#allocation7], 0  ;;  %s320_s0 = inlined_call_operand.<no memory space> [shape: f32[1], index: 0, kind: input, shape index: {}]   ;;  %s321_s1 = inlined_call_operand.vmem [shape: f32[1,20], index: 1, kind: input, shape index: {}]   ;;  %s322_s2 = inlined_call_operand.vmem [shape: f32[1,20], index: 2, kind: input, shape index: {}]   ;;  %s323_s3 = inlined_call_operand.hbm [shape: f32[24,384], index: 3, kind: input, shape index: {}]   ;;  %s324_s4 = inlined_call_operand.hbm [shape: f32[1,1], index: 4, kind: output, shape index: {}]  }
   0x1   :  { %11 = vsyncpa [#allocation8], 0  ;;  %s20_s17 = sshll.u32 %s323_s3, 4  ;;  %s276_s18 = smov [#allocation6]   ;;  %s21_s17 = int_to_ptr.hbm [resolvable:$true] %s20_s17 }
   0x2   :  { %s22_s19 = sshll.u32 %s276_s18, 4  ;;  %s277_s20 = smov 384   ;;  %s23_s19 = int_to_ptr.vmem [resolvable:$true] %s22_s19 }
   0x3   :  { %s278_s21 = smov 24  }
   0x4   :  { %28 = dma.hbm_to_vmem [thread:$0]  %s21_s17, 1152, %s23_s19, [#allocation7], %s277_s20, %s277_s20, %s278_s21  }
   0x5   :  { %272 = dma.done.wait [#allocation7], 1152  }
   0x6   :  { %273 = vsyncadd [#allocation7], 4294966144  ;;  %v49_v0 = vld [vmem:[#allocation6 + $0x30] sm:$0xff]  ;;  %v64_v1 = vld [vmem:[#allocation6 + $0x38] sm:$0xff]  ;;  %vm170_vm0 = vcmask 155648   ;;  %vm147_vm7 = vcmask 7168  }
   0x7   :  { %v79_v2 = vld [vmem:[#allocation6 + $0x40] sm:$0xff]  ;;  %v55_v3 = vmul.f32 %v49_v0, %v49_v0  ;;  %v70_v4 = vmul.f32 %v64_v1, %v64_v1  ;;  %v62_v7 = vld [vmem:[#allocation6 + $0x8] sm:$0xff]  ;;  %v77_v8 = vld [vmem:[#allocation6 + $0x10] sm:$0xff]  ;;  %s205_s7 = sshll.u32 %s324_s4, 4  ;;  %s279_s10 = smov [#allocation9]   ;;  %s206_s7 = int_to_ptr.hbm [resolvable:$true] %s205_s7 }
   0x8   :  { %v85_v5 = vmul.f32 %v79_v2, %v79_v2  ;;  %v47_v6 = vld [vmem:[#allocation6] sm:$0xff]  ;;  %v68_v10 = vmul.f32 %v62_v7, %v62_v7  ;;  %v83_v11 = vmul.f32 %v77_v8, %v77_v8  ;;  %v48_v12 = vld [vmem:[#allocation6 + $0x18] sm:$0xff]  ;;  %v78_v19 = vld [vmem:[#allocation6 + $0x28] sm:$0xff] }
   0x9   :  { %v53_v9 = vmul.f32 %v47_v6, %v47_v6  ;;  %v63_v13 = vld [vmem:[#allocation6 + $0x20] sm:$0xff]  ;;  %v73_v14 = vadd.f32 %v70_v4, %v55_v3  ;;  %v54_v16 = vmul.f32 %v48_v12, %v48_v12  ;;  %v84_v22 = vmul.f32 %v78_v19, %v78_v19 }
   0xa   :  { %v69_v17 = vmul.f32 %v63_v13, %v63_v13  ;;  %v169_v24 = vld [vmem:[%s321_s1] sm:$0x1] }
   0xb   :  { %v71_v15 = vadd.f32 %v68_v10, %v53_v9  ;;  %v88_v18 = vadd.f32 %v85_v5, %v73_v14  ;;  %v171_v25 = vsel %vm170_vm0, %v169_v24, 0.0  ;;  %v181_v26 = vld [vmem:[%s322_s2] sm:$0x1] }
   0xc   :  { %v72_v21 = vadd.f32 %v69_v17, %v54_v16  ;;  %172 = vadd.xlane.f32.xlu2 %v171_v25  ;;  %v182_v29 = vsel %vm170_vm0, %v181_v26, 0.0 }
   0xd   :  { %v86_v20 = vadd.f32 %v83_v11, %v71_v15  ;;  %102 = vadd.xlane.f32.xlu1 %v88_v18 }
   0xe   :  { %v87_v23 = vadd.f32 %v84_v22, %v72_v21 }
   0xf   :  { %98 = vadd.xlane.f32.xlu0 %v86_v20 }
  0x14   :  { %183 = vadd.xlane.f32.xlu2 %v182_v29 }
  0x17   :  { %100 = vadd.xlane.f32.xlu0 %v87_v23 }
  0x7f   :  { %v173_v8 = vpop.xlane.xlu2 %172 }
  0x80   :  { %v103_v27 = vpop.xlane.xlu1 %102  ;;  %v174_v10 = vrot.slane %v173_v8, 4 }
  0x81   :  { %230 = vrsqrt.f32 %v103_v27  ;;  %vm135_vm2 = vcmp.eq.f32.partialorder %v103_v27, inf  ;;  %v138_v54 = vand.u32 2147483648, %v103_v27  ;;  %vm137_vm4 = vcmp.eq.f32.partialorder %v103_v27, 0.0 }
  0x82   :  { %v99_v28 = vpop.xlane.xlu0 %98  ;;  %v175_v12 = vadd.f32 %v174_v10, %v173_v8 }
  0x83   :  { %232 = vrsqrt.f32 %v99_v28  ;;  %vm111_vm1 = vcmp.eq.f32.partialorder %v99_v28, inf  ;;  %v114_v50 = vand.u32 2147483648, %v99_v28  ;;  %vm113_vm3 = vcmp.eq.f32.partialorder %v99_v28, 0.0 }
  0x84   :  { %v176_v14 = vrot.slane %v175_v12, 2 }
  0x86   :  { %v177_v19 = vadd.f32 %v176_v14, %v175_v12 }
  0x87   :  { %v231_v30 = vpop.eup %230  ;;  %v184_v9 = vpop.xlane.xlu2 %183 }
  0x88   :  { %v129_v32 = vmul.f32 %v231_v30, %v103_v27  ;;  %v185_v11 = vrot.slane %v184_v9, 4  ;;  %v178_v23 = vrot.slane %v177_v19, 1 }
  0x89   :  { %v233_v31 = vpop.eup %232 }
  0x8a   :  { %v105_v33 = vmul.f32 %v233_v31, %v99_v28  ;;  %v101_v34 = vpop.xlane.xlu0 %100  ;;  %v130_v36 = vmul.f32 %v231_v30, %v129_v32  ;;  %v186_v13 = vadd.f32 %v185_v11, %v184_v9 }
  0x8b   :  { %234 = vrsqrt.f32 %v101_v34  ;;  %vm123_vm5 = vcmp.eq.f32.partialorder %v101_v34, inf  ;;  %v126_v59 = vand.u32 2147483648, %v101_v34  ;;  %vm125_vm6 = vcmp.eq.f32.partialorder %v101_v34, 0.0 }
  0x8c   :  { %v106_v35 = vmul.f32 %v233_v31, %v105_v33  ;;  %v131_v38 = vmul.f32 0.5, %v130_v36  ;;  %v187_v16 = vrot.slane %v186_v13, 2 }
  0x8e   :  { %v107_v37 = vmul.f32 0.5, %v106_v35  ;;  %v132_v40 = vsub.f32 1.5, %v131_v38  ;;  %v188_v20 = vadd.f32 %v187_v16, %v186_v13 }
  0x90   :  { %v108_v39 = vsub.f32 1.5, %v107_v37  ;;  %v133_v44 = vmul.f32 %v231_v30, %v132_v40  ;;  %v189_v25 = vrot.slane %v188_v20, 1 }
  0x91   :  { %v235_v41 = vpop.eup %234 }
  0x92   :  { %v117_v42 = vmul.f32 %v235_v41, %v101_v34  ;;  %v109_v43 = vmul.f32 %v233_v31, %v108_v39  ;;  %v134_v47 = vmul.f32 %v133_v44, %v103_v27 }
  0x94   :  { %v118_v45 = vmul.f32 %v235_v41, %v117_v42  ;;  %v110_v46 = vmul.f32 %v109_v43, %v99_v28  ;;  %v136_v52 = vsel %vm135_vm2, %v103_v27, %v134_v47  ;;  %v179_v27 = vadd.f32 %v178_v23, %v177_v19 }
  0x95   :  { %v139_v56 = vsel %vm137_vm4, %v138_v54, %v136_v52 }
  0x96   :  { %v119_v48 = vmul.f32 0.5, %v118_v45  ;;  %v112_v49 = vsel %vm111_vm1, %v99_v28, %v110_v46  ;;  %v218_v61 = vadd.f32 -1.0, %v139_v56  ;;  %v190_v28 = vadd.f32 %v189_v25, %v188_v20 }
  0x97   :  { %v115_v53 = vsel %vm113_vm3, %v114_v50, %v112_v49 }
  0x98   :  { %v120_v51 = vsub.f32 1.5, %v119_v48  ;;  %v216_v58 = vadd.f32 -1.0, %v115_v53  ;;  %v146_v2 = vmul.f32 %v218_v61, %v218_v61 }
  0x9a   :  { %v121_v55 = vmul.f32 %v235_v41, %v120_v51  ;;  %v144_v0 = vmul.f32 %v216_v58, %v216_v58  ;;  %v151_v6 = vsel %vm147_vm7, %v146_v2, 0.0 }
  0x9c   :  { %v122_v57 = vmul.f32 %v121_v55, %v101_v34  ;;  %v148_v3 = vsel %vm147_vm7, %v144_v0, 0.0 }
  0x9e   :  { %v124_v60 = vsel %vm123_vm5, %v101_v34, %v122_v57 }
  0x9f   :  { %v127_v62 = vsel %vm125_vm6, %v126_v59, %v124_v60 }
  0xa0   :  { %v217_v63 = vadd.f32 -1.0, %v127_v62 }
  0xa2   :  { %v145_v1 = vmul.f32 %v217_v63, %v217_v63 }
  0xa4   :  { %v149_v4 = vsel %vm147_vm7, %v145_v1, 0.0 }
  0xa5   :  { %v150_v5 = vadd.f32 %v149_v4, %v148_v3 }
  0xa7   :  { %v152_v7 = vadd.f32 %v151_v6, %v150_v5 }
  0xa9   :  { %153 = vadd.xlane.f32.xlu1 %v152_v7 }
 0x11c   :  { %v154_v15 = vpop.xlane.xlu1 %153 }
 0x11d   :  { %v155_v17 = vrot.slane %v154_v15, 4 }
 0x11f   :  { %v156_v18 = vadd.f32 %v155_v17, %v154_v15 }
 0x121   :  { %v157_v21 = vrot.slane %v156_v18, 2 }
 0x123   :  { %v158_v22 = vadd.f32 %v157_v21, %v156_v18 }
 0x125   :  { %v159_v24 = vrot.slane %v158_v22, 1 }
 0x127   :  { %v160_v26 = vadd.f32 %v159_v24, %v158_v22 }
 0x129   :  { %220 = vpush %v160_v26 }
 0x12a   :  { %222 = vpush %v179_v27 }
 0x12b   :  { %224 = vpush %v190_v28 }
 0x15a   :  { %s221_s1 = spop %220 }
 0x15b   :  { %s219_s2 = sadd.f32 -4.0, %s221_s1  ;;  %s223_s25 = spop %222 }
 0x15c   :  { %s225_s26 = spop %224 }
 0x15d   :  { %s195_s29 = smul.f32 %s219_s2, %s320_s0  ;;  %s194_s30 = ssub.f32 %s223_s25, %s225_s26 }
 0x15f   :  { %s196_s8 = ssub.f32 %s194_s30, %s195_s29 }
 0x161   :  { %s197_s9 = smul.f32 0.05, %s196_s8 }
 0x163   :  { %199 = sst [smem:[#allocation9]] %s197_s9 }
 0x164   :  { %208 = dma.smem_to_hbm %s279_s10, 16, %s206_s7, [#allocation8]  }
 0x165   :  { %274 = dma.done.wait [#allocation8], 16  }
 0x166   :  { %275 = vsyncadd [#allocation8], 4294967280 }
 0x167   :  { %213 = sfence }
 0x168   :  { %214 = vsyncpa [#allocation7], 1 }
 0x169   :  { %215 = vsyncpa [#allocation8], 1 }

</bundles_post_ra>
